<compile_context>
chip_gen: v7x
topology: tpu7x:2x2x1
jax: 0.10.0
libtpu: 0.0.40
codegen_flags: <defaults>
</compile_context>

<pallas_src>
import math
from functools import partial

import numpy as np
import jax
import jax.numpy as jnp
from jax import lax
from jax.experimental import pallas as pl
from jax.experimental.pallas import tpu as pltpu

LN_EPS = 1e-5  # nn.LayerNorm default eps (norm_layer=nn.LayerNorm in the module signature)


# ----------------------------- in-kernel helpers -----------------------------

def _layer_norm(v, w, b, eps):
    mu = jnp.mean(v, axis=-1, keepdims=True)
    var = jnp.mean((v - mu) * (v - mu), axis=-1, keepdims=True)
    return (v - mu) * lax.rsqrt(var + eps) * w + b


def _gelu_tanh(x):
    # tanh-GELU (tanh runs on the EUP slot). ~1e-3 abs diff vs torch's exact erf GELU.
    c = math.sqrt(2.0 / math.pi)
    return 0.5 * x * (1.0 + jnp.tanh(c * (x + 0.044715 * x * x * x)))


def _vmem_capacity_bytes():
    try:
        info = pltpu.get_tpu_info()
        cap = getattr(info, "vmem_capacity_bytes", None)
        if cap:
            return int(cap)
    except Exception:
        pass
    return 128 * 2**20  # v5e/v6e default


# ----------------------------- transformer block ------------------------------

def block_kernel(x_ref,
                 ln1_w_ref, ln1_b_ref, qkv_w_ref, proj_w_ref, proj_b_ref,
                 ln2_w_ref, ln2_b_ref, fc1_w_ref, fc1_b_ref, fc2_w_ref, fc2_b_ref,
                 *rest, num_heads, head_dim, fuse_norm, n_proj):
    """Fused pre-LN transformer block (+ optional final-LN and projection-head epilogues).

    rest = [norm_w, norm_b]            (if fuse_norm)
           + n_proj projection weights
           + out_ref
           + [ln_out_ref]              (if fuse_norm)
           + n_proj projection outputs
    """
    n_in_extra = (2 if fuse_norm else 0) + n_proj
    extra_in, outs = rest[:n_in_extra], rest[n_in_extra:]
    if fuse_norm:
        norm_w_ref, norm_b_ref = extra_in[0], extra_in[1]
        head_w_refs = extra_in[2:]
    else:
        head_w_refs = extra_in
    out_ref = outs[0]
    ln_out_ref = outs[1] if fuse_norm else None
    proj_out_refs = outs[(2 if fuse_norm else 1):]

    D = num_heads * head_dim
    scale = head_dim ** -0.5

    x = x_ref[...]                                                  # (N, D) f32 residual
    N = x.shape[0]

    # ---- attention branch: one LN, one fused QKV matmul ----
    h = _layer_norm(x, ln1_w_ref[...], ln1_b_ref[...], LN_EPS).astype(jnp.bfloat16)
    qkv = jnp.dot(h, qkv_w_ref[...],
                  preferred_element_type=jnp.float32).astype(jnp.bfloat16)   # (N, 3D)

    # lane-aligned slices of the fused result (D is a multiple of 128)
    q = qkv[:, :D].reshape(N, num_heads, head_dim)
    k = qkv[:, D:2 * D].reshape(N, num_heads, head_dim)
    v = qkv[:, 2 * D:].reshape(N, num_heads, head_dim)

    logits = jnp.einsum('qhd,khd->hqk', q, k,
                        preferred_element_type=jnp.float32) * scale          # (H, N, N) f32
    logits = logits - jnp.max(logits, axis=-1, keepdims=True)
    p = jnp.exp(logits)                                                       # single-pass exp
    p = p * pl.reciprocal(jnp.sum(p, axis=-1, keepdims=True), approx=True)

    o = jnp.einsum('hqk,khd->qhd', p.astype(jnp.bfloat16), v,
                   preferred_element_type=jnp.float32)                        # (N, H, hd) f32
    o = o.reshape(N, D).astype(jnp.bfloat16)
    attn = jnp.dot(o, proj_w_ref[...],
                   preferred_element_type=jnp.float32) + proj_b_ref[...]
    x = x + attn

    # ---- MLP branch ----
    h2 = _layer_norm(x, ln2_w_ref[...], ln2_b_ref[...], LN_EPS).astype(jnp.bfloat16)
    h2 = jnp.dot(h2, fc1_w_ref[...], preferred_element_type=jnp.float32) + fc1_b_ref[...]
    h2 = _gelu_tanh(h2)
    h2 = jnp.dot(h2.astype(jnp.bfloat16), fc2_w_ref[...],
                 preferred_element_type=jnp.float32) + fc2_b_ref[...]
    x_new = x + h2

    out_ref[...] = x_new.astype(out_ref.dtype)

    # ---- fused epilogues (final LayerNorm / projection heads on the raw feature) ----
    if fuse_norm:
        ln_out_ref[...] = _layer_norm(x_new, norm_w_ref[...], norm_b_ref[...], LN_EPS)
    if n_proj:
        x_bf = x_new.astype(jnp.bfloat16)
        for i in range(n_proj):
            proj_out_refs[i][...] = jnp.dot(x_bf, head_w_refs[i][...],
                                            preferred_element_type=jnp.float32)


def _block_vmem_limit(N, D, Hdn, H, teacher_dims):
    bf, f = 2, 4
    weights = (4 * D * D + 2 * D * Hdn + sum(D * t for t in teacher_dims)) * bf \
              + (9 * D + Hdn) * f
    resid = N * D * f
    qkv = N * 3 * D * (f + bf)
    attn = 2 * H * N * N * f + N * D * (f + bf)
    mlp = N * Hdn * (f + bf)
    outs = (2 * N * D + sum(N * t for t in teacher_dims)) * f
    need = 2 * (weights + resid + outs) + qkv + attn + mlp     # ~double-buffered I/O + live values
    cap = int(0.75 * _vmem_capacity_bytes())                   # ~48 MiB v7x, ~96 MiB v5e/v6e
    return int(min(max(2 * need, 32 * 2**20), cap))


def run_block(x, p, *, num_heads, head_dim, norm=None, proj_ws=()):
    """One transformer block. Optionally fuses the final LayerNorm (norm=(w,b)) and any number
    of projection heads (proj_ws) into the same kernel. Returns a tuple:
      (x_out [, ln_out] [, proj_out_0, proj_out_1, ...])."""
    B, N, D = x.shape
    assert D == num_heads * head_dim
    Hdn = p["fc1_w"].shape[1]
    fuse_norm = norm is not None
    n_proj = len(proj_ws)

    kern = partial(block_kernel, num_heads=num_heads, head_dim=head_dim,
                   fuse_norm=fuse_norm, n_proj=n_proj)

    def w_spec(shape):
        return pl.BlockSpec(shape, lambda b: (0,) * len(shape))

    seq_spec = pl.BlockSpec((None, N, D), lambda b: (b, 0, 0))

    in_specs = [seq_spec,
                w_spec((1, D)), w_spec((1, D)),        # ln1 w, b
                w_spec((D, 3 * D)),                    # fused qkv weight (bf16)
                w_spec((D, D)), w_spec((1, D)),        # attn proj w (bf16), b
                w_spec((1, D)), w_spec((1, D)),        # ln2 w, b
                w_spec((D, Hdn)), w_spec((1, Hdn)),    # fc1 w (bf16), b
                w_spec((Hdn, D)), w_spec((1, D))]      # fc2 w (bf16), b
    args = [x, p["ln1_w"], p["ln1_b"], p["qkv_w"], p["proj_w"], p["proj_b"],
            p["ln2_w"], p["ln2_b"], p["fc1_w"], p["fc1_b"], p["fc2_w"], p["fc2_b"]]

    out_shapes = [jax.ShapeDtypeStruct((B, N, D), jnp.float32)]
    out_specs = [seq_spec]

    if fuse_norm:
        in_specs += [w_spec((1, D)), w_spec((1, D))]
        args += [norm[0], norm[1]]
        out_shapes.append(jax.ShapeDtypeStruct((B, N, D), jnp.float32))
        out_specs.append(seq_spec)

    teacher_dims = []
    for w in proj_ws:
        Td = w.shape[1]
        teacher_dims.append(Td)
        in_specs.append(w_spec((D, Td)))
        args.append(w)
        out_shapes.append(jax.ShapeDtypeStruct((B, N, Td), jnp.float32))
        out_specs.append(pl.BlockSpec((None, N, Td), lambda b: (b, 0, 0)))

    return pl.pallas_call(
        kern,
        out_shape=tuple(out_shapes),
        grid=(B,),
        in_specs=in_specs,
        out_specs=tuple(out_specs),
        compiler_params=pltpu.CompilerParams(
            dimension_semantics=("parallel",),
            vmem_limit_bytes=_block_vmem_limit(N, D, Hdn, num_heads, teacher_dims)),
    )(*args)


# ------------------------------- patch embed -----------------------------------

def patch_embed_kernel(p_ref, w_ref, b_ref, pos_ref, out_ref):
    y = jnp.dot(p_ref[...], w_ref[...], preferred_element_type=jnp.float32)
    out_ref[...] = y + b_ref[...] + pos_ref[...]


def run_patch_embed(patches, w, b, pos):
    B, NP, P = patches.shape
    D = w.shape[1]
    TN = 128 if NP % 128 == 0 else NP          # token tile (full token dim for small NP)
    grid = (B, NP // TN)
    return pl.pallas_call(
        patch_embed_kernel,
        out_shape=jax.ShapeDtypeStruct((B, NP, D), jnp.float32),
        grid=grid,
        in_specs=[pl.BlockSpec((None, TN, P), lambda b, t: (b, t, 0)),   # bf16 patches
                  pl.BlockSpec((P, D), lambda b, t: (0, 0)),
                  pl.BlockSpec((1, D), lambda b, t: (0, 0)),
                  pl.BlockSpec((TN, D), lambda b, t: (t, 0))],
        out_specs=pl.BlockSpec((None, TN, D), lambda b, t: (b, t, 0)),
        compiler_params=pltpu.CompilerParams(
            dimension_semantics=("parallel", "parallel")),
    )(patches, w, b, pos)


# --------------------------------- forward ------------------------------------

def encoder_forward(video, mask, params, layer_to_get, *,
                    patch_size, tubelet_size, num_heads, head_dim):
    B, C, T, H, W = video.shape
    tt, ps = tubelet_size, patch_size

    # non-overlapping Conv3d patch embed == patch extraction (layout only) + matmul
    patches = video.reshape(B, C, T // tt, tt, H // ps, ps, W // ps, ps)
    patches = patches.transpose(0, 2, 4, 6, 1, 3, 5, 7)           # (B, t', h', w', C, tt, ps, ps)
    patches = patches.reshape(B, (T // tt) * (H // ps) * (W // ps), C * tt * ps * ps)
    patches = patches.astype(jnp.bfloat16)                        # halve patch-embed input traffic
    x = run_patch_embed(patches, params["patch_w"], params["patch_b"], params["pos_embed"])

    # x_vis = x[~mask].reshape(B, -1, C): assumes the same visible count per batch element
    keep = np.asarray(~mask)
    n_vis = int(keep[0].sum())
    vis_idx = np.stack([np.nonzero(keep[b])[0][:n_vis] for b in range(B)]).astype(np.int32)
    x_vis = jnp.take_along_axis(x, jnp.asarray(vis_idx)[:, :, None], axis=1)

    depth = len(params["blocks"])
    dir_layers = sorted(set(layer_to_get["dir"]))
    gen_layers = sorted(set(layer_to_get["gen"]))
    dir_proj, gen_proj = {}, {}
    x_final = None

    for l, bp in enumerate(params["blocks"]):
        layer = l + 1
        is_last = layer == depth

        # projection heads fused into this block (same head indexing as the PyTorch module:
        # position of the feature within its own dir/gen list)
        proj_ws, slots = [], []
        if layer in dir_layers:
            i = dir_layers.index(layer)
            proj_ws.append(params["proj_heads"][i]); slots.append(("dir", i))
        if layer in gen_layers:
            i = gen_layers.index(layer)
            proj_ws.append(params["proj_heads"][i]); slots.append(("gen", i))

        norm = (params["norm_w"], params["norm_b"]) if is_last else None
        outs = run_block(x_vis, bp, num_heads=num_heads, head_dim=head_dim,
                         norm=norm, proj_ws=tuple(proj_ws))

        idx = 0
        x_vis = outs[idx]; idx += 1
        if is_last:
            x_final = outs[idx]; idx += 1
        for kind, i in slots:
            (dir_proj if kind == "dir" else gen_proj)[i] = outs[idx]; idx += 1

    dir_list = [dir_proj[i] for i in sorted(dir_proj)]
    gen_list = [gen_proj[i] for i in sorted(gen_proj)]
    return x_final, dir_list, gen_list


# ---------------------------- deterministic init -------------------------------

def xavier_uniform(key, fan_out, fan_in):
    bound = math.sqrt(6.0 / (fan_in + fan_out))
    return jax.random.uniform(key, (fan_out, fan_in), jnp.float32, -bound, bound)


def get_sinusoid_encoding_table(n_position, d_hid):
    pos = np.arange(n_position, dtype=np.float64)[:, None]
    div = np.power(10000.0, 2.0 * (np.arange(d_hid) // 2) / d_hid)
    tbl = pos / div
    tbl[:, 0::2] = np.sin(tbl[:, 0::2])
    tbl[:, 1::2] = np.cos(tbl[:, 1::2])
    return jnp.asarray(tbl, jnp.float32)


def init_params(key, *, in_chans, tubelet, patch_size, num_patches,
                embed_dim, depth, num_heads, mlp_ratio, teacher_dim, n_proj_heads):
    D = embed_dim
    Hdn = int(D * mlp_ratio)
    P = in_chans * tubelet * patch_size * patch_size
    keys = jax.random.split(key, depth + 3)

    # Conv3d patch-embed keeps PyTorch's default (kaiming-uniform-ish) init
    bound = 1.0 / math.sqrt(P)
    patch_w = jax.random.uniform(keys[0], (D, P), jnp.float32, -bound, bound)
    patch_b = jax.random.uniform(keys[1], (1, D), jnp.float32, -bound, bound)

    blocks = []
    for i in range(depth):
        k1, k2, k3, k4 = jax.random.split(keys[2 + i], 4)
        blocks.append({
            "ln1_w": jnp.ones((1, D), jnp.float32),
            "ln1_b": jnp.zeros((1, D), jnp.float32),
            "qkv_w": xavier_uniform(k1, 3 * D, D).T.astype(jnp.bfloat16),   # (D, 3D); qkv_bias=False
            "proj_w": xavier_uniform(k2, D, D).T.astype(jnp.bfloat16),      # (D, D)
            "proj_b": jnp.zeros((1, D), jnp.float32),
            "ln2_w": jnp.ones((1, D), jnp.float32),
            "ln2_b": jnp.zeros((1, D), jnp.float32),
            "fc1_w": xavier_uniform(k3, Hdn, D).T.astype(jnp.bfloat16),     # (D, Hdn)
            "fc1_b": jnp.zeros((1, Hdn), jnp.float32),
            "fc2_w": xavier_uniform(k4, D, Hdn).T.astype(jnp.bfloat16),     # (Hdn, D)
            "fc2_b": jnp.zeros((1, D), jnp.float32),
        })

    proj_keys = jax.random.split(keys[2 + depth], max(n_proj_heads, 1))
    proj_heads = [xavier_uniform(proj_keys[i], teacher_dim, D).T.astype(jnp.bfloat16)
                  for i in range(n_proj_heads)]

    return {
        "patch_w": patch_w.T.astype(jnp.bfloat16),    # (P, D)
        "patch_b": patch_b,
        "pos_embed": get_sinusoid_encoding_table(num_patches, D),
        "blocks": blocks,
        "norm_w": jnp.ones((1, D), jnp.float32),
        "norm_b": jnp.zeros((1, D), jnp.float32),
        "proj_heads": proj_heads,
    }


# ----------------------------------- main --------------------------------------

if __name__ == "__main__":
    # small, lane-aligned config consistent with the module
    B, C, T, H, W = 2, 3, 4, 64, 64
    patch_size, tubelet = 16, 2
    embed_dim, depth, num_heads, mlp_ratio = 256, 2, 2, 4.0
    head_dim = embed_dim // num_heads
    teacher_dim = 384
    layer_to_get = {"dir": [1], "gen": [2]}

    num_patches = (T // tubelet) * (H // patch_size) * (W // patch_size)   # 32
    num_masked = num_patches // 2

    root = jax.random.PRNGKey(0)
    kx, kmask, kparam = jax.random.split(root, 3)

    video = jax.random.normal(kx, (B, C, T, H, W), jnp.float32)

    mask_np = np.zeros((B, num_patches), dtype=bool)
    mkeys = jax.random.split(kmask, B)
    for b in range(B):
        perm = np.asarray(jax.random.permutation(mkeys[b], num_patches))
        mask_np[b, perm[:num_masked]] = True
    mask = jnp.asarray(mask_np)

    params = init_params(kparam, in_chans=C, tubelet=tubelet, patch_size=patch_size,
                         num_patches=num_patches, embed_dim=embed_dim, depth=depth,
                         num_heads=num_heads, mlp_ratio=mlp_ratio, teacher_dim=teacher_dim,
                         n_proj_heads=len(layer_to_get["dir"]))

    x_out, dir_proj, gen_proj = encoder_forward(
        video, mask, params, layer_to_get,
        patch_size=patch_size, tubelet_size=tubelet,
        num_heads=num_heads, head_dim=head_dim)

    jax.block_until_ready((x_out, dir_proj, gen_proj))

    n_vis = num_patches - num_masked
    assert x_out.shape == (B, n_vis, embed_dim), x_out.shape
    assert len(dir_proj) == 1 and dir_proj[0].shape == (B, n_vis, teacher_dim)
    assert len(gen_proj) == 1 and gen_proj[0].shape == (B, n_vis, teacher_dim)
    assert all(bool(jnp.all(jnp.isfinite(a))) for a in (x_out, dir_proj[0], gen_proj[0]))
    print("KERNEL_OK")
</pallas_src>

<mosaic_0001>
module attributes {stable_mosaic.version = 11 : i64} {
  func.func @patch_embed_kernel(%arg0: i32, %arg1: i32, %arg2: memref<1x32x1536xbf16, #tpu.memory_space<vmem>>, %arg3: memref<1536x256xbf16, #tpu.memory_space<vmem>>, %arg4: memref<1x256xf32, #tpu.memory_space<vmem>>, %arg5: memref<32x256xf32, #tpu.memory_space<vmem>>, %arg6: memref<1x32x256xf32, #tpu.memory_space<vmem>>) attributes {dimension_semantics = [#tpu.dimension_semantics<parallel>, #tpu.dimension_semantics<parallel>], iteration_bounds = array<i64: 2, 1>, scalar_prefetch = 0 : i64, scratch_operands = 0 : i64, tpu.core_type = #tpu.core_type<tc>, window_params = [{transform_indices = @transform_0, window_bounds = array<i64: 1, 32, 1536>}, {pipeline_mode = #tpu.pipeline_mode<synchronous>, transform_indices = @transform_1, window_bounds = array<i64: 1536, 256>}, {pipeline_mode = #tpu.pipeline_mode<synchronous>, transform_indices = @transform_2, window_bounds = array<i64: 1, 256>}, {transform_indices = @transform_3, window_bounds = array<i64: 32, 256>}, {transform_indices = @transform_4, window_bounds = array<i64: 1, 32, 256>}]} {
    %c0 = arith.constant 0 : index
    %c0_0 = arith.constant 0 : index
    %c0_1 = arith.constant 0 : index
    %0 = vector.load %arg2[%c0, %c0_0, %c0_1] : memref<1x32x1536xbf16, #tpu.memory_space<vmem>>, vector<1x32x1536xbf16>
    %1 = vector.shape_cast %0 : vector<1x32x1536xbf16> to vector<32x1536xbf16>
    %c0_2 = arith.constant 0 : index
    %c0_3 = arith.constant 0 : index
    %2 = vector.load %arg3[%c0_2, %c0_3] : memref<1536x256xbf16, #tpu.memory_space<vmem>>, vector<1536x256xbf16>
    %cst = arith.constant dense<0.000000e+00> : vector<32x256xf32>
    %3 = tpu.matmul %1, %2, %cst {dimension_numbers = #tpu.dot_dimension_numbers<[1], [0], [0], [1], [0, 0, 1, 1], [], []>} : vector<32x1536xbf16>, vector<1536x256xbf16>, vector<32x256xf32> -> vector<32x256xf32>
    %c0_4 = arith.constant 0 : index
    %c0_5 = arith.constant 0 : index
    %4 = vector.load %arg4[%c0_4, %c0_5] : memref<1x256xf32, #tpu.memory_space<vmem>>, vector<1x256xf32>
    %5 = vector.broadcast %4 : vector<1x256xf32> to vector<32x256xf32>
    %6 = arith.addf %3, %5 : vector<32x256xf32>
    %c0_6 = arith.constant 0 : index
    %c0_7 = arith.constant 0 : index
    %7 = vector.load %arg5[%c0_6, %c0_7] : memref<32x256xf32, #tpu.memory_space<vmem>>, vector<32x256xf32>
    %8 = arith.addf %6, %7 : vector<32x256xf32>
    %c0_8 = arith.constant 0 : index
    %c0_9 = arith.constant 0 : index
    %c0_10 = arith.constant 0 : index
    %9 = vector.load %arg6[%c0_8, %c0_9, %c0_10] : memref<1x32x256xf32, #tpu.memory_space<vmem>>, vector<1x32x256xf32>
    %10 = vector.shape_cast %9 : vector<1x32x256xf32> to vector<32x256xf32>
    %11 = vector.shape_cast %8 : vector<32x256xf32> to vector<1x32x256xf32>
    tpu.vector_store %arg6[%c0_8, %c0_9, %c0_10], %11 {strides = array<i32>} : memref<1x32x256xf32, #tpu.memory_space<vmem>>, vector<1x32x256xf32>,
    return
  }
  func.func @transform_0(%arg0: i32, %arg1: i32) -> (i32, i32, i32) {
    %c0_i32 = arith.constant 0 : i32
    %c0_i32_0 = arith.constant 0 : i32
    return %arg0, %arg1, %c0_i32 : i32, i32, i32
  }
  func.func @transform_1(%arg0: i32, %arg1: i32) -> (i32, i32) {
    %c0_i32 = arith.constant 0 : i32
    %c0_i32_0 = arith.constant 0 : i32
    %c0_i32_1 = arith.constant 0 : i32
    return %c0_i32, %c0_i32_0 : i32, i32
  }
  func.func @transform_2(%arg0: i32, %arg1: i32) -> (i32, i32) {
    %c0_i32 = arith.constant 0 : i32
    %c0_i32_0 = arith.constant 0 : i32
    %c0_i32_1 = arith.constant 0 : i32
    return %c0_i32, %c0_i32_0 : i32, i32
  }
  func.func @transform_3(%arg0: i32, %arg1: i32) -> (i32, i32) {
    %c0_i32 = arith.constant 0 : i32
    %c0_i32_0 = arith.constant 0 : i32
    return %arg1, %c0_i32 : i32, i32
  }
  func.func @transform_4(%arg0: i32, %arg1: i32) -> (i32, i32, i32) {
    %c0_i32 = arith.constant 0 : i32
    %c0_i32_0 = arith.constant 0 : i32
    return %arg0, %arg1, %c0_i32 : i32, i32, i32
  }
}

</mosaic_0001>

<bundles_post_ra>
// kernel: tpu_custom_call.1
= control target key start
LH: loop header
LB: loop body
LE: loop exit
PB: predicated region body
PF: predicated region fallthrough
CT: control target
= control target key end

     0   :  { %9 = vsyncpa [#allocation3], 0  ;;  %s3255_s0 = inlined_call_operand.hbm [shape: bf16[2,32,1536], index: 0, kind: input, shape index: {}]   ;;  %s3256_s1 = inlined_call_operand.hbm [shape: bf16[1536,256], index: 1, kind: input, shape index: {}]   ;;  %s3257_s2 = inlined_call_operand.vmem [shape: f32[1,256], index: 2, kind: input, shape index: {}]   ;;  %s3258_s3 = inlined_call_operand.hbm [shape: f32[32,256], index: 3, kind: input, shape index: {}]   ;;  %s3259_s4 = inlined_call_operand.hbm [shape: f32[2,32,256], index: 4, kind: output, shape index: {}]  }
   0x1   :  { %11 = vsyncpa [#allocation3 + $0x1], 0 }
   0x2   :  { %12 = vsyncpa [#allocation6], 0 }
   0x3   :  { %13 = vsyncpa [#allocation4], 0 }
   0x4   :  { %15 = vsyncpa [#allocation4 + $0x1], 0  ;;  %s2961_s15 = smov 0   ;;  %s2963_s16 = smov 0  }
   0x5   :  { %s2965_s17 = smov 0   ;;  %s2967_s18 = smov 0  }
   0x6   :  { %s2969_s19 = smov 0   ;;  %s2971_s20 = smov 0  }
   0x7 LB: > { %s2051_s21 = sadd.s32 4294967295, %s2922_s20   ;;  %s2052_s22 = sadd.s32 4294967294, %s2922_s20   ;;  %s2922_s20 = sphi %s2971_s20, %s21_s20   ;;  %s2918_s19 = sphi %s2969_s19, %s3281_s19   ;;  %s2914_s18 = sphi %s2967_s18, %s3280_s18   ;;  %s2910_s17 = sphi %s2965_s17, %s3279_s17   ;;  %s2906_s16 = sphi %s2963_s16, %s3278_s16   ;;  %s2902_s15 = sphi %s2961_s15, %s3277_s15  }
   0x8   : > { %p55_p0 = scmp.ne.s32.totalorder %s2906_s16, %s2902_s15  ;;  %p2995_p1 = scmp.eq.s32.totalorder %s2051_s21, 0 }
   0x9   : > { %p2999_p2 = scmp.eq.s32.totalorder %s2051_s21, 1  ;;  %p155_p3 = scmp.eq.s32.totalorder %s2052_s22, 1 }
   0xa   : > { %s3264_s23 = scalar_select %p2995_p1, 1, 0 }
   0xb   : > { %p3005_p4 = por %p2995_p1, %p55_p0  ;;  %p2053_p5 = scmp.ge.s32.totalorder %s2922_s20, 1 }
   0xc   : > { %p3010_p6 = por %p155_p3, %p55_p0  ;;  %p162_p7 = scmp.lt.s32.totalorder %s2922_s20, 3 }
   0xd   : > { %s3266_s25 = scalar_select %p3005_p4, 1, 0 }
   0xe   : > { %s3267_s26 = scalar_select %p3010_p6, 1, 0 }
   0xf   : > { %p3015_p8 = pnand %p2053_p5, %p162_p7  ;;  %s2924_s28 = smov [#allocation5]  }
  0x10   : > { %s174_s29 = sshll.u32 %s2924_s28, 4  ;;  %s2925_s5 = smov [#allocation7]   ;;  %s3019_s29 = int_to_ptr.vmem [resolvable:$true] %s174_s29 }
  0x11   : > { %p2347_p9 = pneg %p3015_p8  ;;  %s194_s6 = sshll.u32 %s2925_s5, 4  ;;  %s3030_s6 = int_to_ptr.vmem [resolvable:$true] %s194_s6 }
  0x12   : > { %s2750_s9 = scalar_lea.hbm %s3256_s1, 24576 }
  0x13   : > { %p3026_p11 = pnand %p2347_p9, %p2995_p1  ;;  %p2751_p12 = scmp.ne.s32.totalorder %s3256_s1, %s2750_s9 }
  0x14   : > { %p2757_p5 = scmp.lt.u32.totalorder %s2750_s9, %s3256_s1 }
  0x15   : > { %p2752_p13 = pneg %p3026_p11 }
  0x17   : > { %p2753_p0 = pnand %p2752_p13, %p2751_p12 }
  0x19   : > { %p2754_p3 = pneg %p2753_p0 }
  0x1b   : > { %p2759_p7 = pnand %p2757_p5, %p2754_p3 }
  0x1d   : > { %2762 = shalt.err (!%p2759_p7)
}
  0x1e   : > { %s2763_s14 = scalar_lea.vmem %s3019_s29, 24576  ;;  %p2771_p1 = scmp.lt.s32.totalorder %s3019_s29, %s3019_s29 }
  0x1f   : > { %p2764_p9 = scmp.ne.s32.totalorder %s3019_s29, %s2763_s14  ;;  %p2772_p12 = scmp.lt.s32.totalorder %s2763_s14, %s2763_s14 }
  0x21   : > { %p2766_p10 = pnand %p2764_p9, %p2752_p13  ;;  %p2773_p0 = por %p2772_p12, %p2771_p1 }
  0x23   : > { %p2767_p6 = pneg %p2766_p10 }
  0x25   : > { %p2774_p4 = pnand %p2773_p0, %p2767_p6 }
  0x27   : > { %2777 = shalt.err (!%p2774_p4)
}
  0x28   : > { %s2926_s21 = smov 128   ;;  %s2927_s22 = smov 8  }
  0x29   : > { %2350 = dma.hbm_to_vmem [thread:$0]  (!%p3026_p11), %s3256_s1, 24576, %s3019_s29, [#allocation6], %s2926_s21, %s2926_s21, %s2927_s22  }
  0x2a   : > { %s2778_s9 = scalar_lea.hbm %s3258_s3, 1024 }
  0x2b   : > { %p2779_p1 = scmp.ne.s32.totalorder %s3258_s3, %s2778_s9  ;;  %p2785_p10 = scmp.lt.u32.totalorder %s2778_s9, %s3258_s3 }
  0x2d   : > { %p2781_p4 = pnand %p2779_p1, %p2752_p13 }
  0x2f   : > { %p2782_p6 = pneg %p2781_p4 }
  0x31   : > { %p2787_p3 = pnand %p2785_p10, %p2782_p6 }
  0x33   : > { %2790 = shalt.err (!%p2787_p3)
}
  0x34   : > { %s2791_s29 = scalar_lea.vmem %s3030_s6, 1024  ;;  %p2799_p12 = scmp.lt.s32.totalorder %s3030_s6, %s3030_s6 }
  0x35   : > { %p2792_p5 = scmp.ne.s32.totalorder %s3030_s6, %s2791_s29  ;;  %p2800_p0 = scmp.lt.s32.totalorder %s2791_s29, %s2791_s29 }
  0x37   : > { %p2794_p7 = pnand %p2792_p5, %p2752_p13  ;;  %p2801_p1 = por %p2800_p0, %p2799_p12 }
  0x39   : > { %p2795_p9 = pneg %p2794_p7 }
  0x3b   : > { %p2802_p4 = pnand %p2801_p1, %p2795_p9 }
  0x3d   : > { %2805 = shalt.err (!%p2802_p4)
}
  0x3e   : > { %s2928_s14 = smov 256   ;;  %s2929_s21 = smov 16  }
  0x3f   : > { %2353 = dma.hbm_to_vmem [thread:$0]  (!%p3026_p11), %s3258_s3, 1024, %s3030_s6, [#allocation6], %s2928_s14, %s2928_s14, %s2929_s21  }
  0x40   : > { %s33_s5 = sadd.s32 1, %s2918_s19  ;;  %s42_s7 = sadd.s32 1, %s2910_s17 }
  0x41   : > { %p35_p13 = scmp.ge.s32.totalorder %s33_s5, 2  ;;  %p49_p6 = scmp.ne.s32.totalorder %s2910_s17, %s2906_s16 }
  0x42   : > { %p50_p10 = scmp.eq.s32.totalorder %s2922_s20, 0  ;;  %p2364_p3 = scmp.lt.s32.totalorder %s2922_s20, 2 }
  0x43   : > { %s3283_s5 = smov (%p35_p13, %s33_s5), 0  ;;  %p3094_p7 = por %p2999_p2, %p49_p6 }
  0x44   : > { %p51_p5 = por %p50_p10, %p49_p6  ;;  %s37_s30 = ssub.s32 %s2918_s19, %s3283_s5 }
  0x45   : > { %s3270_s8 = scalar_select %p3094_p7, 1, 0 }
  0x46   : > { %s208_s9 = sand.u32 1, %s2910_s17   ;;  %p40_p9 = scmp.eq.s32.totalorder %s37_s30, 0 }
  0x47   : > { %s2332_s6 = smul.u32 192, %s208_s9  ;;  %p3101_p11 = pnand %p2364_p3, %p51_p5 }
  0x48   : > { %s3106_s11 = scalar_select %p40_p9, %s2910_s17, %s42_s7  }
  0x49   : > { %s2333_s12 = smul.u32 3072, %s2918_s19  ;;  %s212_s13 = scalar_lea.vmem [#allocation2], %s2332_s6 }
  0x4a   : > { %s222_s29 = sshll.u32 %s212_s13, 4  ;;  %s3116_s22 = scalar_lea.sflag [#allocation3], %s208_s9  ;;  %s3114_s29 = int_to_ptr.vmem [resolvable:$true] %s222_s29 }
  0x4b   : > { %s3112_s21 = scalar_lea.hbm %s3255_s0, %s2333_s12  ;;  %p2808_p12 = pneg %p3101_p11 }
  0x4c   : > { %s2806_s28 = scalar_lea.hbm %s3112_s21, 3072  ;;  %s2811_s6 = scalar_lea.hbm %s3255_s0, 6144 }
  0x4d   : > { %p2807_p2 = scmp.ne.s32.totalorder %s3112_s21, %s2806_s28  ;;  %p2812_p4 = scmp.lt.u32.totalorder %s3112_s21, %s3255_s0 }
  0x4e   : > { %p2813_p13 = scmp.lt.u32.totalorder %s2811_s6, %s2806_s28  ;;  %p2815_p10 = scmp.lt.u32.totalorder %s2806_s28, %s3112_s21 }
  0x4f   : > { %p2809_p0 = pnand %p2808_p12, %p2807_p2 }
  0x50   : > { %p2814_p6 = por %p2813_p13, %p2812_p4 }
  0x51   : > { %p2810_p1 = pneg %p2809_p0 }
  0x52   : > { %p2816_p3 = por %p2815_p10, %p2814_p6 }
  0x54   : > { %p2817_p5 = pnand %p2816_p3, %p2810_p1 }
  0x56   : > { %2820 = shalt.err (!%p2817_p5)
}
  0x57   : > { %s2821_s9 = scalar_lea.vmem %s3114_s29, 3072  ;;  %s2930_s24 = smov [#allocation2]  }
  0x58   : > { %p2822_p9 = scmp.ne.s32.totalorder %s3114_s29, %s2821_s9  ;;  %s2826_s14 = sshll.u32 %s2930_s24, 4  ;;  %s2827_s14 = int_to_ptr.vmem [resolvable:$false] %s2826_s14 }
  0x59   : > { %s2828_s7 = scalar_lea.vmem %s2827_s14, 6144  ;;  %p2829_p7 = scmp.lt.s32.totalorder %s3114_s29, %s2827_s14 }
  0x5a   : > { %p2824_p2 = pnand %p2822_p9, %p2808_p12  ;;  %p2830_p4 = scmp.lt.s32.totalorder %s2828_s7, %s2821_s9 }
  0x5c   : > { %p2825_p0 = pneg %p2824_p2  ;;  %p2831_p13 = por %p2830_p4, %p2829_p7 }
  0x5e   : > { %p2832_p6 = pnand %p2831_p13, %p2825_p0 }
  0x60   : > { %2835 = shalt.err (!%p2832_p6)
}
  0x61   : > { %s2931_s28 = smov 768   ;;  %s2932_s30 = smov 48  }
  0x62   : > { %2357 = dma.hbm_to_vmem [thread:$0]  (!%p3101_p11), %s3112_s21, 3072, %s3114_s29, %s3116_s22, %s2931_s28, %s2931_s28, %s2932_s30  }
  0x63   : > { %234 = sbr.rel (%p3015_p8) target bundleno = 547 (0x223), region = 36  ;;  %s3147_s6 = sand.u32 (!%p3015_p8), 1, %s2906_s16  }
  0x64   : > { %s2334_s12 = smul.u32 (!%p3015_p8), 192, %s3147_s6  ;;  %s237_s13 = scalar_lea.sflag (!%p3015_p8), [#allocation3], %s3147_s6 }
  0x65   : > { %p3272_p7 = scmp.ne.s32.totalorder (!%p3015_p8), %s3266_s25, 0 }
  0x66   : > { %s3151_s9 = scalar_lea.vmem (!%p3015_p8), [#allocation2], %s2334_s12 }
  0x6a   : > { %2889 = dma.done.wait (%p3272_p7), %s237_s13, 3072  }
  0x6b   : > { %2891 = vsyncadd (%p3272_p7), %s237_s13, 4294964224  ;;  %p3273_p11 = scmp.ne.s32.totalorder %s3264_s23, 0 }
  0x6d   : > { %2893 = dma.done.wait (%p3273_p11), [#allocation6], 25600  }
  0x6e   : > { %2895 = vsyncadd (%p3273_p11), [#allocation6], 4294941696  ;;  %v2426_v0 = vld [vmem:[#allocation5 + $0x4] ss:$8 sps:$4 sm:$0xff]   ;;  %v2430_v2 = vld [vmem:[#allocation5] ss:$8 sps:$4 sm:$0xff]  }
  0x6f   : > { %v2428_v1 = vld [vmem:[#allocation5 + $0x304] ss:$8 sps:$4 sm:$0xff]   ;;  %1584 = vmatprep.subr.bf16.mxu1 %v2426_v0  ;;  %v2431_v3 = vld [vmem:[#allocation5 + $0x300] ss:$8 sps:$4 sm:$0xff]   ;;  %v2432_v4 = vld [vmem:[#allocation5 + $0x14] ss:$8 sps:$4 sm:$0xff]  }
  0x70   : > { %1743 = vmatprep.subr.bf16.mxu0 %v2428_v1  ;;  %1585 = vmatpush1.bf16.msra.mxu1 %v2430_v2  ;;  %v2434_v5 = vld [vmem:[#allocation5 + $0x314] ss:$8 sps:$4 sm:$0xff]   ;;  %v2436_v6 = vld [vmem:[#allocation5 + $0x10] ss:$8 sps:$4 sm:$0xff]   ;;  %v2438_v8 = vld [vmem:[#allocation5 + $0x24] ss:$8 sps:$4 sm:$0xff]  }
  0x71   : > { %1744 = vmatpush1.bf16.msra.mxu0 %v2431_v3  ;;  %1586 = vmatprep.subr.bf16.mxu1 %v2432_v4  ;;  %v2437_v7 = vld [vmem:[#allocation5 + $0x310] ss:$8 sps:$4 sm:$0xff]   ;;  %v2440_v9 = vld [vmem:[#allocation5 + $0x324] ss:$8 sps:$4 sm:$0xff]   ;;  %v2442_v10 = vld [vmem:[#allocation5 + $0x20] ss:$8 sps:$4 sm:$0xff]  }
  0x72   : > { %1745 = vmatprep.subr.bf16.mxu0 %v2434_v5  ;;  %v2443_v11 = vld [vmem:[#allocation5 + $0x320] ss:$8 sps:$4 sm:$0xff]   ;;  %v2444_v12 = vld [vmem:[#allocation5 + $0x34] ss:$8 sps:$4 sm:$0xff]   ;;  %v2448_v14 = vld [vmem:[#allocation5 + $0x30] ss:$8 sps:$4 sm:$0xff]  }
  0x73   : > { %v2446_v13 = vld [vmem:[#allocation5 + $0x334] ss:$8 sps:$4 sm:$0xff]   ;;  %v2449_v15 = vld [vmem:[#allocation5 + $0x330] ss:$8 sps:$4 sm:$0xff]   ;;  %v2450_v16 = vld [vmem:[#allocation5 + $0x44] ss:$8 sps:$4 sm:$0xff]  }
  0x74   : > { %1587 = vmatpush1.bf16.msra.mxu1 %v2436_v6  ;;  %v2452_v17 = vld [vmem:[#allocation5 + $0x344] ss:$8 sps:$4 sm:$0xff]   ;;  %v2454_v18 = vld [vmem:[#allocation5 + $0x40] ss:$8 sps:$4 sm:$0xff]   ;;  %v2456_v20 = vld [vmem:[#allocation5 + $0x54] ss:$8 sps:$4 sm:$0xff]  }
  0x75   : > { %1746 = vmatpush1.bf16.msra.mxu0 %v2437_v7  ;;  %1588 = vmatprep.subr.bf16.mxu1 %v2438_v8  ;;  %v2455_v19 = vld [vmem:[#allocation5 + $0x340] ss:$8 sps:$4 sm:$0xff]   ;;  %v2458_v21 = vld [vmem:[#allocation5 + $0x354] ss:$8 sps:$4 sm:$0xff]   ;;  %v2460_v22 = vld [vmem:[#allocation5 + $0x50] ss:$8 sps:$4 sm:$0xff]  }
  0x76   : > { %1747 = vmatprep.subr.bf16.mxu0 %v2440_v9  ;;  %v2461_v23 = vld [vmem:[#allocation5 + $0x350] ss:$8 sps:$4 sm:$0xff]   ;;  %v2462_v24 = vld [vmem:[#allocation5 + $0x64] ss:$8 sps:$4 sm:$0xff]   ;;  %v2466_v26 = vld [vmem:[#allocation5 + $0x60] ss:$8 sps:$4 sm:$0xff]  }
  0x77   : > { %v2464_v25 = vld [vmem:[#allocation5 + $0x364] ss:$8 sps:$4 sm:$0xff]   ;;  %v2467_v27 = vld [vmem:[#allocation5 + $0x360] ss:$8 sps:$4 sm:$0xff]   ;;  %v2468_v28 = vld [vmem:[#allocation5 + $0x74] ss:$8 sps:$4 sm:$0xff]  }
  0x78   : > { %1589 = vmatpush1.bf16.msra.mxu1 %v2442_v10  ;;  %v2470_v29 = vld [vmem:[#allocation5 + $0x374] ss:$8 sps:$4 sm:$0xff]   ;;  %v2472_v30 = vld [vmem:[#allocation5 + $0x70] ss:$8 sps:$4 sm:$0xff]   ;;  %v2474_v32 = vld [vmem:[#allocation5 + $0x84] ss:$8 sps:$4 sm:$0xff]  }
  0x79   : > { %1748 = vmatpush1.bf16.msra.mxu0 %v2443_v11  ;;  %1590 = vmatprep.subr.bf16.mxu1 %v2444_v12  ;;  %v2473_v31 = vld [vmem:[#allocation5 + $0x370] ss:$8 sps:$4 sm:$0xff]   ;;  %v2476_v33 = vld [vmem:[#allocation5 + $0x384] ss:$8 sps:$4 sm:$0xff]   ;;  %v2478_v34 = vld [vmem:[#allocation5 + $0x80] ss:$8 sps:$4 sm:$0xff]  }
  0x7a   : > { %1749 = vmatprep.subr.bf16.mxu0 %v2446_v13  ;;  %v2479_v35 = vld [vmem:[#allocation5 + $0x380] ss:$8 sps:$4 sm:$0xff]   ;;  %v2480_v36 = vld [vmem:[#allocation5 + $0x94] ss:$8 sps:$4 sm:$0xff]   ;;  %v2484_v38 = vld [vmem:[#allocation5 + $0x90] ss:$8 sps:$4 sm:$0xff]  }
  0x7b   : > { %v2482_v37 = vld [vmem:[#allocation5 + $0x394] ss:$8 sps:$4 sm:$0xff]   ;;  %v2485_v39 = vld [vmem:[#allocation5 + $0x390] ss:$8 sps:$4 sm:$0xff]   ;;  %v2486_v40 = vld [vmem:[#allocation5 + $0xa4] ss:$8 sps:$4 sm:$0xff]  }
  0x7c   : > { %1591 = vmatpush1.bf16.msra.mxu1 %v2448_v14  ;;  %v2488_v41 = vld [vmem:[#allocation5 + $0x3a4] ss:$8 sps:$4 sm:$0xff]   ;;  %v2490_v42 = vld [vmem:[#allocation5 + $0xa0] ss:$8 sps:$4 sm:$0xff]   ;;  %v2492_v44 = vld [vmem:[#allocation5 + $0xb4] ss:$8 sps:$4 sm:$0xff]  }
  0x7d   : > { %1750 = vmatpush1.bf16.msra.mxu0 %v2449_v15  ;;  %1592 = vmatprep.subr.bf16.mxu1 %v2450_v16  ;;  %v2491_v43 = vld [vmem:[#allocation5 + $0x3a0] ss:$8 sps:$4 sm:$0xff]   ;;  %v2494_v45 = vld [vmem:[#allocation5 + $0x3b4] ss:$8 sps:$4 sm:$0xff]   ;;  %v2496_v46 = vld [vmem:[#allocation5 + $0xb0] ss:$8 sps:$4 sm:$0xff]  }
  0x7e   : > { %1751 = vmatprep.subr.bf16.mxu0 %v2452_v17  ;;  %v2497_v47 = vld [vmem:[#allocation5 + $0x3b0] ss:$8 sps:$4 sm:$0xff]   ;;  %v2524_v48 = vld [vmem:[%s3151_s9 + $0x4] ss:$48 sps:$4 sm:$0xff]   ;;  %v2530_v51 = vld [vmem:[%s3151_s9 + $0x1c] ss:$48 sps:$4 sm:$0xff]  }
  0x7f   : > { %v2498_v49 = vld [vmem:[#allocation5 + $0xc4] ss:$8 sps:$4 sm:$0xff]   ;;  %1616 = vmatprep.mubr.bf16.mxu1 %v2524_v48  ;;  %v2502_v52 = vld [vmem:[#allocation5 + $0xc0] ss:$8 sps:$4 sm:$0xff]   ;;  %v2504_v54 = vld [vmem:[#allocation5 + $0xd4] ss:$8 sps:$4 sm:$0xff]   ;;  %1775 = vmatprep.mubr.bf16.mxu0 %v2530_v51 }
  0x80   : > { %1593 = vmatpush1.bf16.msra.mxu1 %v2454_v18  ;;  %v2500_v50 = vld [vmem:[#allocation5 + $0x3c4] ss:$8 sps:$4 sm:$0xff]   ;;  %v2503_v53 = vld [vmem:[#allocation5 + $0x3c0] ss:$8 sps:$4 sm:$0xff]   ;;  %v2506_v55 = vld [vmem:[#allocation5 + $0x3d4] ss:$8 sps:$4 sm:$0xff]  }
  0x81   : > { %1752 = vmatpush1.bf16.msra.mxu0 %v2455_v19  ;;  %1594 = vmatprep.subr.bf16.mxu1 %v2456_v20  ;;  %v2508_v56 = vld [vmem:[#allocation5 + $0xd0] ss:$8 sps:$4 sm:$0xff]   ;;  %v2510_v58 = vld [vmem:[#allocation5 + $0xe4] ss:$8 sps:$4 sm:$0xff]   ;;  %v2514_v60 = vld [vmem:[#allocation5 + $0xe0] ss:$8 sps:$4 sm:$0xff]  }
  0x82   : > { %1753 = vmatprep.subr.bf16.mxu0 %v2458_v21  ;;  %v2509_v57 = vld [vmem:[#allocation5 + $0x3d0] ss:$8 sps:$4 sm:$0xff]   ;;  %v2512_v59 = vld [vmem:[#allocation5 + $0x3e4] ss:$8 sps:$4 sm:$0xff]   ;;  %v2515_v61 = vld [vmem:[#allocation5 + $0x3e0] ss:$8 sps:$4 sm:$0xff]  }
  0x83   : > { %v2516_v62 = vld [vmem:[#allocation5 + $0xf4] ss:$8 sps:$4 sm:$0xff]   ;;  %v2520_v0 = vld [vmem:[#allocation5 + $0xf0] ss:$8 sps:$4 sm:$0xff]   ;;  %v2527_v2 = vld [vmem:[#allocation5 + $0x104] ss:$8 sps:$4 sm:$0xff]  }
  0x84   : > { %1595 = vmatpush1.bf16.msra.mxu1 %v2460_v22  ;;  %v2518_v63 = vld [vmem:[#allocation5 + $0x3f4] ss:$8 sps:$4 sm:$0xff]   ;;  %v2521_v1 = vld [vmem:[#allocation5 + $0x3f0] ss:$8 sps:$4 sm:$0xff]   ;;  %v2533_v3 = vld [vmem:[#allocation5 + $0x404] ss:$8 sps:$4 sm:$0xff]  }
  0x85   : > { %1754 = vmatpush1.bf16.msra.mxu0 %v2461_v23  ;;  %1596 = vmatprep.subr.bf16.mxu1 %v2462_v24  ;;  %v2522_v4 = vld [vmem:[%s3151_s9] ss:$48 sps:$4 sm:$0xff]   ;;  %v2528_v6 = vld [vmem:[%s3151_s9 + $0x18] ss:$48 sps:$4 sm:$0xff]   ;;  %v2536_v8 = vld [vmem:[#allocation5 + $0x114] ss:$8 sps:$4 sm:$0xff]  }
  0x86   : > { %1755 = vmatprep.subr.bf16.mxu0 %v2464_v25  ;;  %v2525_v5 = vld [vmem:[#allocation5 + $0x100] ss:$8 sps:$4 sm:$0xff]   ;;  %v2539_v9 = vld [vmem:[#allocation5 + $0x414] ss:$8 sps:$4 sm:$0xff]   ;;  %v2534_v10 = vld [vmem:[#allocation5 + $0x110] ss:$8 sps:$4 sm:$0xff]  }
  0x87   : > { %v2531_v7 = vld [vmem:[#allocation5 + $0x400] ss:$8 sps:$4 sm:$0xff]   ;;  %v2537_v11 = vld [vmem:[#allocation5 + $0x410] ss:$8 sps:$4 sm:$0xff]   ;;  %v2542_v12 = vld [vmem:[#allocation5 + $0x124] ss:$8 sps:$4 sm:$0xff]  }
  0x88   : > { %1597 = vmatpush1.bf16.msra.mxu1 %v2466_v26  ;;  %v2545_v13 = vld [vmem:[#allocation5 + $0x424] ss:$8 sps:$4 sm:$0xff]   ;;  %v2540_v14 = vld [vmem:[#allocation5 + $0x120] ss:$8 sps:$4 sm:$0xff]   ;;  %v2548_v16 = vld [vmem:[#allocation5 + $0x134] ss:$8 sps:$4 sm:$0xff]  }
  0x89   : > { %1756 = vmatpush1.bf16.msra.mxu0 %v2467_v27  ;;  %1598 = vmatprep.subr.bf16.mxu1 %v2468_v28  ;;  %v2543_v15 = vld [vmem:[#allocation5 + $0x420] ss:$8 sps:$4 sm:$0xff]   ;;  %v2551_v17 = vld [vmem:[#allocation5 + $0x434] ss:$8 sps:$4 sm:$0xff]   ;;  %v2546_v18 = vld [vmem:[#allocation5 + $0x130] ss:$8 sps:$4 sm:$0xff]  }
  0x8a   : > { %1757 = vmatprep.subr.bf16.mxu0 %v2470_v29  ;;  %v2549_v19 = vld [vmem:[#allocation5 + $0x430] ss:$8 sps:$4 sm:$0xff]   ;;  %v2554_v20 = vld [vmem:[#allocation5 + $0x144] ss:$8 sps:$4 sm:$0xff]   ;;  %v2552_v22 = vld [vmem:[#allocation5 + $0x140] ss:$8 sps:$4 sm:$0xff]  }
  0x8b   : > { %v2557_v21 = vld [vmem:[#allocation5 + $0x444] ss:$8 sps:$4 sm:$0xff]   ;;  %v2555_v23 = vld [vmem:[#allocation5 + $0x440] ss:$8 sps:$4 sm:$0xff]   ;;  %v2560_v24 = vld [vmem:[#allocation5 + $0x154] ss:$8 sps:$4 sm:$0xff]  }
  0x8c   : > { %1599 = vmatpush1.bf16.msra.mxu1 %v2472_v30  ;;  %v2563_v25 = vld [vmem:[#allocation5 + $0x454] ss:$8 sps:$4 sm:$0xff]   ;;  %v2558_v26 = vld [vmem:[#allocation5 + $0x150] ss:$8 sps:$4 sm:$0xff]   ;;  %v2566_v29 = vld [vmem:[#allocation5 + $0x164] ss:$8 sps:$4 sm:$0xff]  }
  0x8d   : > { %1758 = vmatpush1.bf16.msra.mxu0 %v2473_v31  ;;  %1600 = vmatprep.subr.bf16.mxu1 %v2474_v32  ;;  %v2561_v27 = vld [vmem:[#allocation5 + $0x450] ss:$8 sps:$4 sm:$0xff]   ;;  %v2612_v28 = vld [vmem:[%s3151_s9 + $0x64] ss:$48 sps:$4 sm:$0xff]   ;;  %v2617_v31 = vld [vmem:[%s3151_s9 + $0x7c] ss:$48 sps:$4 sm:$0xff]  }
  0x8e   : > { %1759 = vmatprep.subr.bf16.mxu0 %v2476_v33  ;;  %v2569_v30 = vld [vmem:[#allocation5 + $0x464] ss:$8 sps:$4 sm:$0xff]   ;;  %v2564_v32 = vld [vmem:[#allocation5 + $0x160] ss:$8 sps:$4 sm:$0xff]   ;;  %v2582_v48 = vld [vmem:[#allocation5 + $0x190] ss:$8 sps:$4 sm:$0xff]  }
  0x8f   : > { %v2567_v33 = vld [vmem:[#allocation5 + $0x460] ss:$8 sps:$4 sm:$0xff]   ;;  %v2593_v51 = vld [vmem:[#allocation5 + $0x4a4] ss:$8 sps:$4 sm:$0xff]   ;;  %s2061_s27 = sshll.u32 %s3147_s6, 6  ;;  %s2283_s21 = sshll.u32 %s2914_s18, 10 }
  0x90   : > { %1601 = vmatpush1.bf16.msra.mxu1 %v2478_v34  ;;  %v2622_v34 = vld [vmem:[%s3151_s9 + $0x60] ss:$48 sps:$4 sm:$0xff]   ;;  %s3189_s10 = scalar_lea.vmem [#allocation8], %s2061_s27  ;;  %s3203_s14 = scalar_lea.hbm %s3259_s4, %s2283_s21 }
  0x91   : > { %1760 = vmatpush1.bf16.msra.mxu0 %v2479_v35  ;;  %1602 = vmatprep.subr.bf16.mxu1 %v2480_v36  ;;  %v2623_v35 = vld [vmem:[%s3151_s9 + $0x78] ss:$48 sps:$4 sm:$0xff]   ;;  %v2572_v36 = vld [vmem:[#allocation5 + $0x174] ss:$8 sps:$4 sm:$0xff]   ;;  %s1943_s29 = sshll.u32 %s3189_s10, 4  ;;  %s1927_s18 = scalar_lea.sflag [#allocation4], %s3147_s6  ;;  %s3197_s29 = int_to_ptr.vmem [resolvable:$true] %s1943_s29 }
  0x92   : > { %1761 = vmatprep.subr.bf16.mxu0 %v2482_v37  ;;  %v2575_v37 = vld [vmem:[#allocation5 + $0x474] ss:$8 sps:$4 sm:$0xff]   ;;  %s2836_s7 = scalar_lea.vmem %s3197_s29, 1024  ;;  %p3274_p12 = scmp.ne.s32.totalorder %s3270_s8, 0 }
  0x93   : > { %p2837_p8 = scmp.ne.s32.totalorder %s3197_s29, %s2836_s7  ;;  %s2933_s28 = smov [#allocation8]  }
  0x94   : > { %1603 = vmatpush1.bf16.msra.mxu1 %v2484_v38  ;;  %v2570_v38 = vld [vmem:[#allocation5 + $0x170] ss:$8 sps:$4 sm:$0xff]   ;;  %s2840_s30 = sshll.u32 %s2933_s28, 4  ;;  %s2841_s30 = int_to_ptr.vmem [resolvable:$false] %s2840_s30 }
  0x95   : > { %1762 = vmatpush1.bf16.msra.mxu0 %v2485_v39  ;;  %1604 = vmatprep.subr.bf16.mxu1 %v2486_v40  ;;  %v2573_v39 = vld [vmem:[#allocation5 + $0x470] ss:$8 sps:$4 sm:$0xff]   ;;  %v2632_v40 = vld [vmem:[%s3151_s9 + $0xc] ss:$48 sps:$4 sm:$0xff]   ;;  %p2838_p1 = pnand %p2837_p8, %p3274_p12  ;;  %s2842_s12 = scalar_lea.vmem %s2841_s30, 2048 }
  0x96   : > { %1763 = vmatprep.subr.bf16.mxu0 %v2488_v41  ;;  %v2578_v41 = vld [vmem:[#allocation5 + $0x184] ss:$8 sps:$4 sm:$0xff]   ;;  %p2843_p3 = scmp.lt.s32.totalorder %s3197_s29, %s2841_s30  ;;  %p2844_p5 = scmp.lt.s32.totalorder %s2842_s12, %s2836_s7 }
  0x97   : > { %p2839_p10 = pneg %p2838_p1 }
  0x98   : > { %1605 = vmatpush1.bf16.msra.mxu1 %v2490_v42  ;;  %v2581_v42 = vld [vmem:[#allocation5 + $0x484] ss:$8 sps:$4 sm:$0xff]   ;;  %p2845_p9 = por %p2844_p5, %p2843_p3 }
  0x99   : > { %1764 = vmatpush1.bf16.msra.mxu0 %v2491_v43  ;;  %1606 = vmatprep.subr.bf16.mxu1 %v2492_v44  ;;  %v2638_v43 = vld [vmem:[%s3151_s9 + $0x24] ss:$48 sps:$4 sm:$0xff]   ;;  %v2576_v44 = vld [vmem:[#allocation5 + $0x180] ss:$8 sps:$4 sm:$0xff]  }
  0x9a   : > { %1765 = vmatprep.subr.bf16.mxu0 %v2494_v45  ;;  %v2579_v45 = vld [vmem:[#allocation5 + $0x480] ss:$8 sps:$4 sm:$0xff]   ;;  %p2846_p2 = pnand %p2845_p9, %p2839_p10 }
  0x9c   : > { %1607 = vmatpush1.bf16.msra.mxu1 %v2496_v46  ;;  %v2584_v46 = vld [vmem:[#allocation5 + $0x194] ss:$8 sps:$4 sm:$0xff]  }
  0x9d   : > { %1766 = vmatpush1.bf16.msra.mxu0 %v2497_v47  ;;  %1608 = vmatprep.subr.bf16.mxu1 %v2498_v49  ;;  %v2587_v47 = vld [vmem:[#allocation5 + $0x494] ss:$8 sps:$4 sm:$0xff]   ;;  %v2585_v49 = vld [vmem:[#allocation5 + $0x490] ss:$8 sps:$4 sm:$0xff]  }
  0x9e   : > { %1767 = vmatprep.subr.bf16.mxu0 %v2500_v50  ;;  %v2590_v50 = vld [vmem:[#allocation5 + $0x1a4] ss:$8 sps:$4 sm:$0xff]  }
  0xa0   : > { %1609 = vmatpush1.bf16.msra.mxu1 %v2502_v52  ;;  %v2588_v52 = vld [vmem:[#allocation5 + $0x1a0] ss:$8 sps:$4 sm:$0xff]  }
  0xa1   : > { %1768 = vmatpush1.bf16.msra.mxu0 %v2503_v53  ;;  %1610 = vmatprep.subr.bf16.mxu1 %v2504_v54  ;;  %v2591_v53 = vld [vmem:[#allocation5 + $0x4a0] ss:$8 sps:$4 sm:$0xff]   ;;  %v2596_v54 = vld [vmem:[#allocation5 + $0x1b4] ss:$8 sps:$4 sm:$0xff]  }
  0xa2   : > { %1769 = vmatprep.subr.bf16.mxu0 %v2506_v55  ;;  %v2599_v55 = vld [vmem:[#allocation5 + $0x4b4] ss:$8 sps:$4 sm:$0xff]  }
  0xa4   : > { %1611 = vmatpush1.bf16.msra.mxu1 %v2508_v56  ;;  %v2594_v56 = vld [vmem:[#allocation5 + $0x1b0] ss:$8 sps:$4 sm:$0xff]  }
  0xa5   : > { %1770 = vmatpush1.bf16.msra.mxu0 %v2509_v57  ;;  %1612 = vmatprep.subr.bf16.mxu1 %v2510_v58  ;;  %v2597_v57 = vld [vmem:[#allocation5 + $0x4b0] ss:$8 sps:$4 sm:$0xff]   ;;  %v2602_v58 = vld [vmem:[#allocation5 + $0x1c4] ss:$8 sps:$4 sm:$0xff]  }
  0xa6   : > { %1771 = vmatprep.subr.bf16.mxu0 %v2512_v59  ;;  %v2605_v59 = vld [vmem:[#allocation5 + $0x4c4] ss:$8 sps:$4 sm:$0xff]  }
  0xa8   : > { %1613 = vmatpush1.bf16.msra.mxu1 %v2514_v60  ;;  %v2600_v60 = vld [vmem:[#allocation5 + $0x1c0] ss:$8 sps:$4 sm:$0xff]  }
  0xa9   : > { %1772 = vmatpush1.bf16.msra.mxu0 %v2515_v61  ;;  %1614 = vmatprep.subr.bf16.mxu1 %v2516_v62  ;;  %v2603_v61 = vld [vmem:[#allocation5 + $0x4c0] ss:$8 sps:$4 sm:$0xff]   ;;  %v2608_v62 = vld [vmem:[#allocation5 + $0x1d4] ss:$8 sps:$4 sm:$0xff]  }
  0xaa   : > { %1773 = vmatprep.subr.bf16.mxu0 %v2518_v63  ;;  %v2611_v63 = vld [vmem:[#allocation5 + $0x4d4] ss:$8 sps:$4 sm:$0xff]  }
  0xac   : > { %1615 = vmatpush1.bf16.msra.mxu1 %v2520_v0  ;;  %v2606_v0 = vld [vmem:[#allocation5 + $0x1d0] ss:$8 sps:$4 sm:$0xff]  }
  0xad   : > { %1774 = vmatpush1.bf16.msra.mxu0 %v2521_v1  ;;  %1637 = vmatprep.subr.bf16.mxu1 %v2527_v2  ;;  %v2609_v1 = vld [vmem:[#allocation5 + $0x4d0] ss:$8 sps:$4 sm:$0xff]   ;;  %v2616_v2 = vld [vmem:[#allocation5 + $0x1e4] ss:$8 sps:$4 sm:$0xff]  }
  0xae   : > { %1796 = vmatprep.subr.bf16.mxu0 %v2533_v3  ;;  %v2621_v3 = vld [vmem:[#allocation5 + $0x4e4] ss:$8 sps:$4 sm:$0xff]  }
  0xaf   : > { %1617 = vmatmul.mubr.bf16.vlgmr.msra.gmra.mrb[0].mxu1 %v2522_v4  ;;  %v2614_v4 = vld [vmem:[#allocation5 + $0x1e0] ss:$8 sps:$4 sm:$0xff]  }
  0xb0   : > { %1776 = vmatmul.mubr.bf16.vlgmr.msra.gmra.mrb[0].mxu0 %v2528_v6  ;;  %1638 = vmatpush1.bf16.msra.mxu1 %v2525_v5  ;;  %v2619_v5 = vld [vmem:[#allocation5 + $0x4e0] ss:$8 sps:$4 sm:$0xff]   ;;  %v2626_v6 = vld [vmem:[#allocation5 + $0x1f4] ss:$8 sps:$4 sm:$0xff]  }
  0xb1   : > { %1797 = vmatpush1.bf16.msra.mxu0 %v2531_v7  ;;  %1639 = vmatprep.subr.bf16.mxu1 %v2536_v8  ;;  %v2629_v7 = vld [vmem:[#allocation5 + $0x4f4] ss:$8 sps:$4 sm:$0xff]   ;;  %v2624_v8 = vld [vmem:[#allocation5 + $0x1f0] ss:$8 sps:$4 sm:$0xff]  }
  0xb2   : > { %1798 = vmatprep.subr.bf16.mxu0 %v2539_v9  ;;  %1626 = vmatprep.mubr.bf16.mxu1 %v2612_v28  ;;  %v2627_v9 = vld [vmem:[#allocation5 + $0x4f0] ss:$8 sps:$4 sm:$0xff]   ;;  %v2656_v28 = vld [vmem:[#allocation5 + $0x234] ss:$8 sps:$4 sm:$0xff]  }
  0xb3   : > { %1785 = vmatprep.mubr.bf16.mxu0 %v2617_v31  ;;  %v2657_v31 = vld [vmem:[#allocation5 + $0x530] ss:$8 sps:$4 sm:$0xff]  }
  0xb4   : > { %1640 = vmatpush1.bf16.msra.mxu1 %v2534_v10  ;;  %v2635_v10 = vld [vmem:[#allocation5 + $0x204] ss:$8 sps:$4 sm:$0xff]  }
  0xb5   : > { %1799 = vmatpush1.bf16.msra.mxu0 %v2537_v11  ;;  %1641 = vmatprep.subr.bf16.mxu1 %v2542_v12  ;;  %v2641_v11 = vld [vmem:[#allocation5 + $0x504] ss:$8 sps:$4 sm:$0xff]   ;;  %v2630_v12 = vld [vmem:[%s3151_s9 + $0x8] ss:$48 sps:$4 sm:$0xff]  }
  0xb6   : > { %1800 = vmatprep.subr.bf16.mxu0 %v2545_v13  ;;  %v2633_v13 = vld [vmem:[#allocation5 + $0x200] ss:$8 sps:$4 sm:$0xff]  }
  0xb7   : > { %1627 = vmatmul.mubr.bf16.gmra.mrb[4].mxu1 %v2622_v34  ;;  %v2665_v34 = vld [vmem:[#allocation5 + $0x544] ss:$8 sps:$4 sm:$0xff]  }
  0xb8   : > { %1642 = vmatpush1.bf16.msra.mxu1 %v2540_v14  ;;  %1786 = vmatmul.mubr.bf16.gmra.mrb[4].mxu0 %v2623_v35  ;;  %v2636_v14 = vld [vmem:[%s3151_s9 + $0x20] ss:$48 sps:$4 sm:$0xff]   ;;  %v2743_v35 = vld [vmem:[%s3151_s9 + $0x2c] ss:$48 sps:$4 sm:$0xff]  }
  0xb9   : > { %1801 = vmatpush1.bf16.msra.mxu0 %v2543_v15  ;;  %1643 = vmatprep.subr.bf16.mxu1 %v2548_v16  ;;  %v2639_v15 = vld [vmem:[#allocation5 + $0x500] ss:$8 sps:$4 sm:$0xff]   ;;  %v2644_v16 = vld [vmem:[#allocation5 + $0x214] ss:$8 sps:$4 sm:$0xff]  }
  0xba   : > { %1802 = vmatprep.subr.bf16.mxu0 %v2551_v17  ;;  %1669 = vmatprep.mubr.bf16.mxu1 %v2632_v40  ;;  %v2647_v17 = vld [vmem:[#allocation5 + $0x514] ss:$8 sps:$4 sm:$0xff]   ;;  %v2666_v40 = vld [vmem:[#allocation5 + $0x250] ss:$8 sps:$4 sm:$0xff]  }
  0xbb   : > { %1828 = vmatprep.mubr.bf16.mxu0 %v2638_v43  ;;  %v2677_v43 = vld [vmem:[#allocation5 + $0x564] ss:$8 sps:$4 sm:$0xff]  }
  0xbc   : > { %1644 = vmatpush1.bf16.msra.mxu1 %v2546_v18  ;;  %v2642_v18 = vld [vmem:[#allocation5 + $0x210] ss:$8 sps:$4 sm:$0xff]  }
  0xbd   : > { %1803 = vmatpush1.bf16.msra.mxu0 %v2549_v19  ;;  %1645 = vmatprep.subr.bf16.mxu1 %v2554_v20  ;;  %v2645_v19 = vld [vmem:[#allocation5 + $0x510] ss:$8 sps:$4 sm:$0xff]   ;;  %v2720_v20 = vld [vmem:[%s3151_s9 + $0x6c] ss:$48 sps:$4 sm:$0xff]  }
  0xbe   : > { %1804 = vmatprep.subr.bf16.mxu0 %v2557_v21  ;;  %v2650_v21 = vld [vmem:[#allocation5 + $0x224] ss:$8 sps:$4 sm:$0xff]  }
  0xc0   : > { %1646 = vmatpush1.bf16.msra.mxu1 %v2552_v22  ;;  %v2722_v22 = vld [vmem:[%s3151_s9 + $0x84] ss:$48 sps:$4 sm:$0xff]  }
  0xc1   : > { %1805 = vmatpush1.bf16.msra.mxu0 %v2555_v23  ;;  %1647 = vmatprep.subr.bf16.mxu1 %v2560_v24  ;;  %v2653_v23 = vld [vmem:[#allocation5 + $0x524] ss:$8 sps:$4 sm:$0xff]   ;;  %v2648_v24 = vld [vmem:[#allocation5 + $0x220] ss:$8 sps:$4 sm:$0xff]  }
  0xc2   : > { %1806 = vmatprep.subr.bf16.mxu0 %v2563_v25  ;;  %v2651_v25 = vld [vmem:[#allocation5 + $0x520] ss:$8 sps:$4 sm:$0xff]  }
  0xc4   : > { %1648 = vmatpush1.bf16.msra.mxu1 %v2558_v26  ;;  %v2724_v26 = vld [vmem:[%s3151_s9 + $0x68] ss:$48 sps:$4 sm:$0xff]  }
  0xc5   : > { %1807 = vmatpush1.bf16.msra.mxu0 %v2561_v27  ;;  %1649 = vmatprep.subr.bf16.mxu1 %v2566_v29  ;;  %v2728_v27 = vld [vmem:[%s3151_s9 + $0x80] ss:$48 sps:$4 sm:$0xff]   ;;  %v2659_v29 = vld [vmem:[#allocation5 + $0x534] ss:$8 sps:$4 sm:$0xff]  }
  0xc6   : > { %1808 = vmatprep.subr.bf16.mxu0 %v2569_v30  ;;  %v2654_v30 = vld [vmem:[#allocation5 + $0x230] ss:$8 sps:$4 sm:$0xff]  }
  0xc8   : > { %1650 = vmatpush1.bf16.msra.mxu1 %v2564_v32  ;;  %v2662_v32 = vld [vmem:[#allocation5 + $0x244] ss:$8 sps:$4 sm:$0xff]  }
  0xc9   : > { %1809 = vmatpush1.bf16.msra.mxu0 %v2567_v33  ;;  %1651 = vmatprep.subr.bf16.mxu1 %v2572_v36  ;;  %v2740_v33 = vld [vmem:[%s3151_s9 + $0x14] ss:$48 sps:$4 sm:$0xff]   ;;  %v2660_v36 = vld [vmem:[#allocation5 + $0x240] ss:$8 sps:$4 sm:$0xff]  }
  0xca   : > { %1810 = vmatprep.subr.bf16.mxu0 %v2575_v37  ;;  %v2663_v37 = vld [vmem:[#allocation5 + $0x540] ss:$8 sps:$4 sm:$0xff]  }
  0xcc   : > { %1652 = vmatpush1.bf16.msra.mxu1 %v2570_v38  ;;  %v2668_v38 = vld [vmem:[#allocation5 + $0x254] ss:$8 sps:$4 sm:$0xff]  }
  0xcd   : > { %1811 = vmatpush1.bf16.msra.mxu0 %v2573_v39  ;;  %1653 = vmatprep.subr.bf16.mxu1 %v2578_v41  ;;  %v2671_v39 = vld [vmem:[#allocation5 + $0x554] ss:$8 sps:$4 sm:$0xff]   ;;  %v2669_v41 = vld [vmem:[#allocation5 + $0x550] ss:$8 sps:$4 sm:$0xff]  }
  0xce   : > { %1812 = vmatprep.subr.bf16.mxu0 %v2581_v42  ;;  %v2674_v42 = vld [vmem:[#allocation5 + $0x264] ss:$8 sps:$4 sm:$0xff]  }
  0xd0   : > { %1654 = vmatpush1.bf16.msra.mxu1 %v2576_v44  ;;  %v2672_v44 = vld [vmem:[#allocation5 + $0x260] ss:$8 sps:$4 sm:$0xff]  }
  0xd1   : > { %1813 = vmatpush1.bf16.msra.mxu0 %v2579_v45  ;;  %1655 = vmatprep.subr.bf16.mxu1 %v2584_v46  ;;  %v2675_v45 = vld [vmem:[#allocation5 + $0x560] ss:$8 sps:$4 sm:$0xff]   ;;  %v2680_v46 = vld [vmem:[#allocation5 + $0x274] ss:$8 sps:$4 sm:$0xff]  }
  0xd2   : > { %1814 = vmatprep.subr.bf16.mxu0 %v2587_v47  ;;  %v2683_v47 = vld [vmem:[#allocation5 + $0x574] ss:$8 sps:$4 sm:$0xff]  }
  0xd4   : > { %1656 = vmatpush1.bf16.msra.mxu1 %v2582_v48  ;;  %v2678_v48 = vld [vmem:[#allocation5 + $0x270] ss:$8 sps:$4 sm:$0xff]  }
  0xd5   : > { %1815 = vmatpush1.bf16.msra.mxu0 %v2585_v49  ;;  %1657 = vmatprep.subr.bf16.mxu1 %v2590_v50  ;;  %v2681_v49 = vld [vmem:[#allocation5 + $0x570] ss:$8 sps:$4 sm:$0xff]   ;;  %v2686_v50 = vld [vmem:[#allocation5 + $0x284] ss:$8 sps:$4 sm:$0xff]  }
  0xd6   : > { %1816 = vmatprep.subr.bf16.mxu0 %v2593_v51  ;;  %v2689_v51 = vld [vmem:[#allocation5 + $0x584] ss:$8 sps:$4 sm:$0xff]  }
  0xd8   : > { %1658 = vmatpush1.bf16.msra.mxu1 %v2588_v52  ;;  %v2684_v52 = vld [vmem:[#allocation5 + $0x280] ss:$8 sps:$4 sm:$0xff]  }
  0xd9   : > { %1817 = vmatpush1.bf16.msra.mxu0 %v2591_v53  ;;  %1659 = vmatprep.subr.bf16.mxu1 %v2596_v54  ;;  %v2687_v53 = vld [vmem:[#allocation5 + $0x580] ss:$8 sps:$4 sm:$0xff]   ;;  %v2692_v54 = vld [vmem:[#allocation5 + $0x294] ss:$8 sps:$4 sm:$0xff]  }
  0xda   : > { %1818 = vmatprep.subr.bf16.mxu0 %v2599_v55  ;;  %v2695_v55 = vld [vmem:[#allocation5 + $0x594] ss:$8 sps:$4 sm:$0xff]  }
  0xdc   : > { %1660 = vmatpush1.bf16.msra.mxu1 %v2594_v56  ;;  %v2690_v56 = vld [vmem:[#allocation5 + $0x290] ss:$8 sps:$4 sm:$0xff]  }
  0xdd   : > { %1819 = vmatpush1.bf16.msra.mxu0 %v2597_v57  ;;  %1661 = vmatprep.subr.bf16.mxu1 %v2602_v58  ;;  %v2693_v57 = vld [vmem:[#allocation5 + $0x590] ss:$8 sps:$4 sm:$0xff]   ;;  %v2698_v58 = vld [vmem:[#allocation5 + $0x2a4] ss:$8 sps:$4 sm:$0xff]  }
  0xde   : > { %1820 = vmatprep.subr.bf16.mxu0 %v2605_v59  ;;  %v2701_v59 = vld [vmem:[#allocation5 + $0x5a4] ss:$8 sps:$4 sm:$0xff]  }
  0xe0   : > { %1662 = vmatpush1.bf16.msra.mxu1 %v2600_v60  ;;  %v2696_v60 = vld [vmem:[#allocation5 + $0x2a0] ss:$8 sps:$4 sm:$0xff]  }
  0xe1   : > { %1821 = vmatpush1.bf16.msra.mxu0 %v2603_v61  ;;  %1663 = vmatprep.subr.bf16.mxu1 %v2608_v62  ;;  %v2699_v61 = vld [vmem:[#allocation5 + $0x5a0] ss:$8 sps:$4 sm:$0xff]   ;;  %v2704_v62 = vld [vmem:[#allocation5 + $0x2b4] ss:$8 sps:$4 sm:$0xff]  }
  0xe2   : > { %1822 = vmatprep.subr.bf16.mxu0 %v2611_v63  ;;  %v2707_v63 = vld [vmem:[#allocation5 + $0x5b4] ss:$8 sps:$4 sm:$0xff]  }
  0xe4   : > { %1664 = vmatpush1.bf16.msra.mxu1 %v2606_v0  ;;  %v2702_v0 = vld [vmem:[#allocation5 + $0x2b0] ss:$8 sps:$4 sm:$0xff]  }
  0xe5   : > { %1823 = vmatpush1.bf16.msra.mxu0 %v2609_v1  ;;  %1665 = vmatprep.subr.bf16.mxu1 %v2616_v2  ;;  %v2705_v1 = vld [vmem:[#allocation5 + $0x5b0] ss:$8 sps:$4 sm:$0xff]   ;;  %v2710_v2 = vld [vmem:[#allocation5 + $0x2c4] ss:$8 sps:$4 sm:$0xff]  }
  0xe6   : > { %1824 = vmatprep.subr.bf16.mxu0 %v2621_v3  ;;  %v2713_v3 = vld [vmem:[#allocation5 + $0x5c4] ss:$8 sps:$4 sm:$0xff]  }
  0xe8   : > { %1666 = vmatpush1.bf16.msra.mxu1 %v2614_v4  ;;  %v2708_v4 = vld [vmem:[#allocation5 + $0x2c0] ss:$8 sps:$4 sm:$0xff]  }
  0xe9   : > { %1825 = vmatpush1.bf16.msra.mxu0 %v2619_v5  ;;  %1667 = vmatprep.subr.bf16.mxu1 %v2626_v6  ;;  %v2711_v5 = vld [vmem:[#allocation5 + $0x5c0] ss:$8 sps:$4 sm:$0xff]   ;;  %v2716_v6 = vld [vmem:[#allocation5 + $0x2d4] ss:$8 sps:$4 sm:$0xff]  }
  0xea   : > { %1826 = vmatprep.subr.bf16.mxu0 %v2629_v7  ;;  %v2719_v7 = vld [vmem:[#allocation5 + $0x5d4] ss:$8 sps:$4 sm:$0xff]  }
  0xec   : > { %1668 = vmatpush1.bf16.msra.mxu1 %v2624_v8  ;;  %v2714_v8 = vld [vmem:[#allocation5 + $0x2d0] ss:$8 sps:$4 sm:$0xff]  }
  0xed   : > { %1827 = vmatpush1.bf16.msra.mxu0 %v2627_v9  ;;  %1690 = vmatprep.subr.bf16.mxu1 %v2635_v10  ;;  %v2717_v9 = vld [vmem:[#allocation5 + $0x5d0] ss:$8 sps:$4 sm:$0xff]   ;;  %v2727_v10 = vld [vmem:[#allocation5 + $0x2e4] ss:$8 sps:$4 sm:$0xff]  }
  0xee   : > { %1849 = vmatprep.subr.bf16.mxu0 %v2641_v11  ;;  %v2731_v11 = vld [vmem:[#allocation5 + $0x5e4] ss:$8 sps:$4 sm:$0xff]  }
  0xef   : > { %1670 = vmatmul.mubr.bf16.vlgmr.msra.gmra.mrb[0].mxu1 %v2630_v12  ;;  %v2725_v12 = vld [vmem:[#allocation5 + $0x2e0] ss:$8 sps:$4 sm:$0xff]  }
  0xf0   : > { %1829 = vmatmul.mubr.bf16.vlgmr.msra.gmra.mrb[0].mxu0 %v2636_v14  ;;  %1691 = vmatpush1.bf16.msra.mxu1 %v2633_v13  ;;  %v2729_v13 = vld [vmem:[#allocation5 + $0x5e0] ss:$8 sps:$4 sm:$0xff]   ;;  %v2734_v14 = vld [vmem:[#allocation5 + $0x2f4] ss:$8 sps:$4 sm:$0xff]  }
  0xf1   : > { %1850 = vmatpush1.bf16.msra.mxu0 %v2639_v15  ;;  %1692 = vmatprep.subr.bf16.mxu1 %v2644_v16  ;;  %v2737_v15 = vld [vmem:[#allocation5 + $0x5f4] ss:$8 sps:$4 sm:$0xff]   ;;  %v2732_v16 = vld [vmem:[#allocation5 + $0x2f0] ss:$8 sps:$4 sm:$0xff]  }
  0xf2   : > { %1851 = vmatprep.subr.bf16.mxu0 %v2647_v17  ;;  %1679 = vmatprep.mubr.bf16.mxu1 %v2720_v20  ;;  %v2735_v17 = vld [vmem:[#allocation5 + $0x5f0] ss:$8 sps:$4 sm:$0xff]   ;;  %v2744_v20 = vld [vmem:[%s3151_s9 + $0x74] ss:$48 sps:$4 sm:$0xff]  }
  0xf3   : > { %1838 = vmatprep.mubr.bf16.mxu0 %v2722_v22  ;;  %v2748_v22 = vld [vmem:[%s3151_s9 + $0x70] ss:$48 sps:$4 sm:$0xff]  }
  0xf4   : > { %1693 = vmatpush1.bf16.msra.mxu1 %v2642_v18  ;;  %v2738_v18 = vld [vmem:[%s3151_s9 + $0x10] ss:$48 sps:$4 sm:$0xff]  }
  0xf5   : > { %1852 = vmatpush1.bf16.msra.mxu0 %v2645_v19  ;;  %1694 = vmatprep.subr.bf16.mxu1 %v2650_v21  ;;  %v2741_v19 = vld [vmem:[%s3151_s9 + $0x28] ss:$48 sps:$4 sm:$0xff]   ;;  %v2746_v21 = vld [vmem:[%s3151_s9 + $0x8c] ss:$48 sps:$4 sm:$0xff]  }
  0xf6   : > { %1853 = vmatprep.subr.bf16.mxu0 %v2653_v23  ;;  %v2749_v23 = vld [vmem:[%s3151_s9 + $0x88] ss:$48 sps:$4 sm:$0xff]  }
  0xf7   : > { %1680 = vmatmul.mubr.bf16.gmra.mrb[4].mxu1 %v2724_v26 }
  0xf8   : > { %1839 = vmatmul.mubr.bf16.gmra.mrb[4].mxu0 %v2728_v27  ;;  %1695 = vmatpush1.bf16.msra.mxu1 %v2648_v24  ;;  %v494_v24 = vlaneseq  ;;  %v492_v27 = vld [vmem:[%s3257_s2] sm:$0x3] }
  0xf9   : > { %1854 = vmatpush1.bf16.msra.mxu0 %v2651_v25  ;;  %1696 = vmatprep.subr.bf16.mxu1 %v2656_v28 }
  0xfa   : > { %1855 = vmatprep.subr.bf16.mxu0 %v2659_v29  ;;  %1722 = vmatprep.mubr.bf16.mxu1 %v2740_v33  ;;  %v495_v25 = vshrl.u32 %v494_v24, 7 }
  0xfb   : > { %1881 = vmatprep.mubr.bf16.mxu0 %v2743_v35 }
  0xfc   : > { %1697 = vmatpush1.bf16.msra.mxu1 %v2654_v30  ;;  %v496_v26 = vsub.s32 0, %v495_v25  ;;  %v500_v28 = vsub.s32 1, %v495_v25 }
  0xfd   : > { %1856 = vmatpush1.bf16.msra.mxu0 %v2657_v31  ;;  %1698 = vmatprep.subr.bf16.mxu1 %v2662_v32 }
  0xfe   : > { %1857 = vmatprep.subr.bf16.mxu0 %v2665_v34  ;;  %v497_v29 = vrot.slane %v492_v27, %v496_v26  ;;  %v501_v30 = vrot.slane %v492_v27, %v500_v28 }
 0x100   : > { %1699 = vmatpush1.bf16.msra.mxu1 %v2660_v36  ;;  %v1902_v36 = vld [vmem:[#allocation7] sm:$0xff] }
 0x101   : > { %1858 = vmatpush1.bf16.msra.mxu0 %v2663_v37  ;;  %1700 = vmatprep.subr.bf16.mxu1 %v2668_v38 }
 0x102   : > { %1859 = vmatprep.subr.bf16.mxu0 %v2671_v39 }
 0x104   : > { %1701 = vmatpush1.bf16.msra.mxu1 %v2666_v40 }
 0x105   : > { %1860 = vmatpush1.bf16.msra.mxu0 %v2669_v41  ;;  %1702 = vmatprep.subr.bf16.mxu1 %v2674_v42  ;;  %v1903_v41 = vld [vmem:[#allocation7 + $0x8] sm:$0xff] }
 0x106   : > { %1861 = vmatprep.subr.bf16.mxu0 %v2677_v43 }
 0x108   : > { %1703 = vmatpush1.bf16.msra.mxu1 %v2672_v44 }
 0x109   : > { %1862 = vmatpush1.bf16.msra.mxu0 %v2675_v45  ;;  %1704 = vmatprep.subr.bf16.mxu1 %v2680_v46  ;;  %v1904_v46 = vld [vmem:[#allocation7 + $0x10] sm:$0xff] }
 0x10a   : > { %1863 = vmatprep.subr.bf16.mxu0 %v2683_v47 }
 0x10c   : > { %1705 = vmatpush1.bf16.msra.mxu1 %v2678_v48 }
 0x10d   : > { %1864 = vmatpush1.bf16.msra.mxu0 %v2681_v49  ;;  %1706 = vmatprep.subr.bf16.mxu1 %v2686_v50  ;;  %v1905_v50 = vld [vmem:[#allocation7 + $0x18] sm:$0xff] }
 0x10e   : > { %1865 = vmatprep.subr.bf16.mxu0 %v2689_v51 }
 0x110   : > { %1707 = vmatpush1.bf16.msra.mxu1 %v2684_v52 }
 0x111   : > { %1866 = vmatpush1.bf16.msra.mxu0 %v2687_v53  ;;  %1708 = vmatprep.subr.bf16.mxu1 %v2692_v54 }
 0x112   : > { %1867 = vmatprep.subr.bf16.mxu0 %v2695_v55 }
 0x114   : > { %1709 = vmatpush1.bf16.msra.mxu1 %v2690_v56 }
 0x115   : > { %1868 = vmatpush1.bf16.msra.mxu0 %v2693_v57  ;;  %1710 = vmatprep.subr.bf16.mxu1 %v2698_v58 }
 0x116   : > { %1869 = vmatprep.subr.bf16.mxu0 %v2701_v59 }
 0x118   : > { %1711 = vmatpush1.bf16.msra.mxu1 %v2696_v60  ;;  %v1906_v60 = vld [vmem:[#allocation7 + $0x20] sm:$0xff] }
 0x119   : > { %1870 = vmatpush1.bf16.msra.mxu0 %v2699_v61  ;;  %1712 = vmatprep.subr.bf16.mxu1 %v2704_v62 }
 0x11a   : > { %1871 = vmatprep.subr.bf16.mxu0 %v2707_v63 }
 0x11c   : > { %1713 = vmatpush1.bf16.msra.mxu1 %v2702_v0 }
 0x11d   : > { %1872 = vmatpush1.bf16.msra.mxu0 %v2705_v1  ;;  %1714 = vmatprep.subr.bf16.mxu1 %v2710_v2  ;;  %v1907_v1 = vld [vmem:[#allocation7 + $0x28] sm:$0xff] }
 0x11e   : > { %1873 = vmatprep.subr.bf16.mxu0 %v2713_v3 }
 0x120   : > { %1715 = vmatpush1.bf16.msra.mxu1 %v2708_v4 }
 0x121   : > { %1874 = vmatpush1.bf16.msra.mxu0 %v2711_v5  ;;  %1716 = vmatprep.subr.bf16.mxu1 %v2716_v6  ;;  %v1908_v6 = vld [vmem:[#allocation7 + $0x30] sm:$0xff] }
 0x122   : > { %1875 = vmatprep.subr.bf16.mxu0 %v2719_v7 }
 0x124   : > { %1717 = vmatpush1.bf16.msra.mxu1 %v2714_v8 }
 0x125   : > { %1876 = vmatpush1.bf16.msra.mxu0 %v2717_v9  ;;  %1718 = vmatprep.subr.bf16.mxu1 %v2727_v10  ;;  %v1909_v10 = vld [vmem:[#allocation7 + $0x38] sm:$0xff] }
 0x126   : > { %1877 = vmatprep.subr.bf16.mxu0 %v2731_v11 }
 0x128   : > { %1719 = vmatpush1.bf16.msra.mxu1 %v2725_v12 }
 0x129   : > { %1878 = vmatpush1.bf16.msra.mxu0 %v2729_v13  ;;  %1720 = vmatprep.subr.bf16.mxu1 %v2734_v14 }
 0x12a   : > { %1879 = vmatprep.subr.bf16.mxu0 %v2737_v15 }
 0x12c   : > { %1721 = vmatpush1.bf16.msra.mxu1 %v2732_v16 }
 0x12d   : > { %1880 = vmatpush1.bf16.msra.mxu0 %v2735_v17 }
 0x12f   : > { %1723 = vmatmul.mubr.bf16.vlgmr.msra.gmra.mrb[0].mxu1 %v2738_v18 }
 0x130   : > { %1882 = vmatmul.mubr.bf16.vlgmr.msra.gmra.mrb[0].mxu0 %v2741_v19  ;;  %1732 = vmatprep.mubr.bf16.mxu1 %v2744_v20 }
 0x131   : > { %1891 = vmatprep.mubr.bf16.mxu0 %v2746_v21 }
 0x137   : > { %1733 = vmatmul.mubr.bf16.gmra.mrb[4].mxu1 %v2748_v22 }
 0x138   : > { %1892 = vmatmul.mubr.bf16.gmra.mrb[4].mxu0 %v2749_v23 }
 0x202   : > { %v1724_v31 = vpop.f32.mrb[0].mxu1 }
 0x203   : > { %v1883_v32 = vpop.f32.mrb[0].mxu0  ;;  %v2284_v33 = vadd.f32 %v1724_v31, %v497_v29  ;;  %v1726_v34 = vpop.f32.mrb[1].mxu1 }
 0x204   : > { %v1885_v35 = vpop.f32.mrb[1].mxu0  ;;  %v2286_v37 = vadd.f32 %v1726_v34, %v501_v30  ;;  %v1728_v38 = vpop.f32.mrb[2].mxu1 }
 0x205   : > { %v1887_v39 = vpop.f32.mrb[2].mxu0  ;;  %v2285_v40 = vadd.f32 %v2284_v33, %v1883_v32  ;;  %v2288_v42 = vadd.f32 %v1728_v38, %v497_v29  ;;  %v1730_v43 = vpop.f32.mrb[3].mxu1 }
 0x206   : > { %v1889_v44 = vpop.f32.mrb[3].mxu0  ;;  %v2287_v45 = vadd.f32 %v2286_v37, %v1885_v35  ;;  %v2290_v47 = vadd.f32 %v1730_v43, %v501_v30 }
 0x207   : > { %v1910_v48 = vadd.f32 %v2285_v40, %v1902_v36  ;;  %v2289_v49 = vadd.f32 %v2288_v42, %v1887_v39 }
 0x208   : > { %v1911_v51 = vadd.f32 %v2287_v45, %v1903_v41  ;;  %v2291_v52 = vadd.f32 %v2290_v47, %v1889_v44 }
 0x209   : > { %1918 = vst [vmem:[%s3189_s10] sm:$0xff] %v1910_v48  ;;  %v1912_v53 = vadd.f32 %v2289_v49, %v1904_v46 }
 0x20a   : > { %1919 = vst [vmem:[%s3189_s10 + $0x8] sm:$0xff] %v1911_v51  ;;  %v1913_v54 = vadd.f32 %v2291_v52, %v1905_v50  ;;  %v1734_v55 = vpop.f32.mrb[4].mxu1 }
 0x20b   : > { %v1893_v56 = vpop.f32.mrb[4].mxu0  ;;  %1920 = vst [vmem:[%s3189_s10 + $0x10] sm:$0xff] %v1912_v53  ;;  %v2292_v57 = vadd.f32 %v1734_v55, %v497_v29  ;;  %v1736_v58 = vpop.f32.mrb[5].mxu1 }
 0x20c   : > { %v1895_v59 = vpop.f32.mrb[5].mxu0  ;;  %1921 = vst [vmem:[%s3189_s10 + $0x18] sm:$0xff] %v1913_v54  ;;  %v2294_v61 = vadd.f32 %v1736_v58, %v501_v30  ;;  %v1738_v62 = vpop.f32.mrb[6].mxu1 }
 0x20d   : > { %v1897_v63 = vpop.f32.mrb[6].mxu0  ;;  %v2293_v0 = vadd.f32 %v2292_v57, %v1893_v56  ;;  %v2296_v2 = vadd.f32 %v1738_v62, %v497_v29  ;;  %v1740_v3 = vpop.f32.mrb[7].mxu1 }
 0x20e   : > { %v1899_v4 = vpop.f32.mrb[7].mxu0  ;;  %v2295_v5 = vadd.f32 %v2294_v61, %v1895_v59  ;;  %v2298_v7 = vadd.f32 %v1740_v3, %v501_v30 }
 0x20f   : > { %v1914_v8 = vadd.f32 %v2293_v0, %v1906_v60  ;;  %v2297_v9 = vadd.f32 %v2296_v2, %v1897_v63 }
 0x210   : > { %v1915_v11 = vadd.f32 %v2295_v5, %v1907_v1  ;;  %v2299_v12 = vadd.f32 %v2298_v7, %v1899_v4 }
 0x211   : > { %1922 = vst [vmem:[%s3189_s10 + $0x20] sm:$0xff] %v1914_v8  ;;  %v1916_v13 = vadd.f32 %v2297_v9, %v1908_v6 }
 0x212   : > { %1923 = vst [vmem:[%s3189_s10 + $0x28] sm:$0xff] %v1915_v11  ;;  %v1917_v14 = vadd.f32 %v2299_v12, %v1909_v10 }
 0x213   : > { %1924 = vst [vmem:[%s3189_s10 + $0x30] sm:$0xff] %v1916_v13 }
 0x214   : > { %1925 = vst [vmem:[%s3189_s10 + $0x38] sm:$0xff] %v1917_v14 }
 0x215   : > { %2849 = shalt.err (!%p2846_p2)
}
 0x216   : > { %s2850_s13 = scalar_lea.hbm %s3203_s14, 1024  ;;  %s2854_s25 = scalar_lea.hbm %s3259_s4, 2048 }
 0x217   : > { %p2851_p0 = scmp.ne.s32.totalorder %s3203_s14, %s2850_s13  ;;  %p2855_p6 = scmp.lt.u32.totalorder %s3203_s14, %s3259_s4 }
 0x218   : > { %p2856_p7 = scmp.lt.u32.totalorder %s2854_s25, %s2850_s13  ;;  %p2858_p8 = scmp.lt.u32.totalorder %s2850_s13, %s3203_s14 }
 0x219   : > { %p2852_p4 = pnand %p2851_p0, %p3274_p12 }
 0x21a   : > { %p2857_p11 = por %p2856_p7, %p2855_p6 }
 0x21b   : > { %p2853_p13 = pneg %p2852_p4 }
 0x21c   : > { %p2859_p1 = por %p2858_p8, %p2857_p11 }
 0x21e   : > { %p2860_p10 = pnand %p2859_p1, %p2853_p13 }
 0x220   : > { %2863 = shalt.err (!%p2860_p10)
}
 0x221   : > { %s2934_s21 = smov 256   ;;  %s2935_s22 = smov 16  }
 0x222   : > { %2345 = dma.vmem_to_hbm [thread:$0]  (%p3274_p12), %s3197_s29, 1024, %s3203_s14, %s1927_s18, %s2934_s21, %s2934_s21, %s2935_s22  }
 0x223 PF: > { %s1958_s24 = sand.u32 1, %s2902_s15   ;;  %p3275_p3 = scmp.ne.s32.totalorder %s3267_s26, 0 }
 0x224   : > { %p3276_p5 = scmp.ge.s32.totalorder %s2922_s20, 2  ;;  %s1959_s7 = scalar_lea.sflag [#allocation4], %s1958_s24 }
 0x226   : > { %p2359_p9 = pnand %p3276_p5, %p3275_p3 }
 0x228   : > { %2897 = dma.done.wait (!%p2359_p9), %s1959_s7, 1024  }
 0x229   : > { %2899 = vsyncadd (!%p2359_p9), %s1959_s7, 4294966272  ;;  %s21_s20 = sadd.s32 1, %s2922_s20   ;;  %s3277_s15 = smov %s2906_s16 }
 0x22a   : > { %p18_p2 = scmp.ge.s32.totalorder %s21_s20, 4   ;;  %s3278_s16 = smov %s2910_s17 }
 0x22b   : > { %s3279_s17 = smov %s3106_s11  ;;  %s3280_s18 = smov %s2918_s19 }
 0x22c   : > { %s3281_s19 = smov %s3283_s5  ;;  %20 = sbr.rel (!%p18_p2) target bundleno = 7 (0x7), region = 90 }
 0x233   :  { %1964 = vsyncpa [#allocation3], 1 }
 0x234   :  { %1966 = vsyncpa [#allocation3 + $0x1], 1 }
 0x235   :  { %1967 = vsyncpa [#allocation6], 1 }
 0x236   :  { %1968 = vsyncpa [#allocation4], 1 }
 0x237   :  { %1970 = vsyncpa [#allocation4 + $0x1], 1 }

</bundles_post_ra>
